<compile_context>
chip_gen: v6e
topology: v6e:2x2x1
jax: 0.10.0
libtpu: 0.0.40
codegen_flags: <defaults>
</compile_context>

<pallas_src>
import jax
import jax.numpy as jnp
from jax import lax
from jax.experimental import pallas as pl
from jax.experimental.pallas import tpu as pltpu

D = 5            # feature width of both Linear layers
LAYER_ROWS = 8   # each layer's packed params padded to one full (8,128) sublane tile
P_ROWS = 2 * LAYER_ROWS


def mlp3_kernel(x_ref, p_ref, o_ref):
    # x_ref: (B, D) f32
    # p_ref: (16, D) f32 packed params, sublane-tile aligned:
    #   rows 0..4  = W1^T, row 5  = b1, rows 6..7   = zero pad   (tile 0)
    #   rows 8..12 = W2^T, row 13 = b2, rows 14..15 = zero pad   (tile 1)
    # All slices below are static ref slices contained in a single sublane tile:
    # no full-slab materialization, no cross-vreg selects.
    x = x_ref[...]
    w1t = p_ref[0:D, :]                                  # (D, D)
    b1 = p_ref[D:D + 1, :]                               # (1, D) -> broadcasts over B
    w2t = p_ref[LAYER_ROWS:LAYER_ROWS + D, :]            # (D, D)
    b2 = p_ref[LAYER_ROWS + D:LAYER_ROWS + D + 1, :]     # (1, D)

    # One MXU contraction per layer; tanh on the EUP; all intermediates f32.
    h = jnp.tanh(
        jnp.dot(x, w1t, preferred_element_type=jnp.float32,
                precision=lax.Precision.HIGHEST) + b1)
    y = jnp.tanh(
        jnp.dot(h, w2t, preferred_element_type=jnp.float32,
                precision=lax.Precision.HIGHEST) + b2)

    o_ref[...] = y.astype(o_ref.dtype)


def pack_params(w1, b1, w2, b2):
    """One-time parameter prep (do NOT call per forward).

    w1, w2: PyTorch Linear weights, shape (out, in) = (5, 5).
    b1, b2: biases, shape (5,).
    Returns a (16, 5) f32 slab: [W1^T | b1 | pad] and [W2^T | b2 | pad], each
    padded to a full 8-row sublane tile so in-kernel slices never cross tiles.
    """
    def layer_slab(w, b):
        s = jnp.zeros((LAYER_ROWS, D), jnp.float32)
        s = s.at[:D, :].set(w.T.astype(jnp.float32))
        s = s.at[D, :].set(b.astype(jnp.float32))
        return s

    return jnp.concatenate([layer_slab(w1, b1), layer_slab(w2, b2)], axis=0)


def mlp3_forward(x, packed_params):
    """x: (B, 5) float32, packed_params: (16, 5) float32 from pack_params()."""
    B, _ = x.shape
    vmem = pl.BlockSpec(memory_space=pltpu.MemorySpace.VMEM)
    cost = pl.CostEstimate(
        flops=2 * (2 * B * D * D + B * D),    # two dense layers incl. bias adds
        transcendentals=2 * B * D,            # two tanh passes
        bytes_accessed=(B * D + P_ROWS * D + B * D) * 4,
    )
    # Single grid-less invocation on purpose: per-grid-step overhead (~0.35 us)
    # exceeds this kernel's entire compute, so no grid / no extra buffering.
    return pl.pallas_call(
        mlp3_kernel,
        out_shape=jax.ShapeDtypeStruct((B, D), jnp.float32),
        in_specs=[vmem, vmem],
        out_specs=vmem,
        cost_estimate=cost,
    )(x, packed_params)


if __name__ == "__main__":
    key = jax.random.PRNGKey(0)
    kx, kw1, kb1, kw2, kb2 = jax.random.split(key, 5)

    # Dummy input per MLP3.get_dummy_input_tensor(): shape (3, 5)
    B = 3
    x = jax.random.normal(kx, (B, D), dtype=jnp.float32)

    # Deterministic parameter init (PyTorch Linear shapes: weight (out, in), bias (out,))
    bound = 1.0 / jnp.sqrt(float(D))
    w1 = jax.random.uniform(kw1, (D, D), jnp.float32, -bound, bound)
    b1 = jax.random.uniform(kb1, (D,), jnp.float32, -bound, bound)
    w2 = jax.random.uniform(kw2, (D, D), jnp.float32, -bound, bound)
    b2 = jax.random.uniform(kb2, (D,), jnp.float32, -bound, bound)

    # One-time parameter packing (hoisted out of the per-call forward path).
    params = jax.block_until_ready(pack_params(w1, b1, w2, b2))

    fwd = jax.jit(mlp3_forward)
    out = jax.block_until_ready(fwd(x, params))

    # Reference in plain JAX at full f32 matmul precision (same semantics as the
    # PyTorch forward: tanh(tanh(x @ W1^T + b1) @ W2^T + b2)).
    h_ref = jnp.tanh(jnp.dot(x, w1.T, precision=lax.Precision.HIGHEST) + b1)
    ref = jnp.tanh(jnp.dot(h_ref, w2.T, precision=lax.Precision.HIGHEST) + b2)

    assert out.shape == (B, D)
    assert jnp.allclose(out, ref, atol=1e-5, rtol=1e-5), "mismatch vs reference"

    print("KERNEL_OK")
</pallas_src>

<mosaic_0001>
module attributes {stable_mosaic.version = 11 : i64} {
  func.func @mlp3_kernel(%arg0: memref<3x5xf32, #tpu.memory_space<vmem>>, %arg1: memref<16x5xf32, #tpu.memory_space<vmem>>, %arg2: memref<3x5xf32, #tpu.memory_space<vmem>>) attributes {dimension_semantics = [], scalar_prefetch = 0 : i64, scratch_operands = 0 : i64, tpu.core_type = #tpu.core_type<tc>} {
    %c0 = arith.constant 0 : index
    %c0_0 = arith.constant 0 : index
    %0 = vector.load %arg0[%c0, %c0_0] : memref<3x5xf32, #tpu.memory_space<vmem>>, vector<3x5xf32>
    %c0_1 = arith.constant 0 : index
    %c0_2 = arith.constant 0 : index
    %1 = vector.load %arg1[%c0_1, %c0_2] : memref<16x5xf32, #tpu.memory_space<vmem>>, vector<5x5xf32>
    %c5 = arith.constant 5 : index
    %c0_3 = arith.constant 0 : index
    %2 = vector.load %arg1[%c5, %c0_3] : memref<16x5xf32, #tpu.memory_space<vmem>>, vector<1x5xf32>
    %c8 = arith.constant 8 : index
    %c0_4 = arith.constant 0 : index
    %3 = vector.load %arg1[%c8, %c0_4] : memref<16x5xf32, #tpu.memory_space<vmem>>, vector<5x5xf32>
    %c13 = arith.constant 13 : index
    %c0_5 = arith.constant 0 : index
    %4 = vector.load %arg1[%c13, %c0_5] : memref<16x5xf32, #tpu.memory_space<vmem>>, vector<1x5xf32>
    %cst = arith.constant dense<0.000000e+00> : vector<3x5xf32>
    %5 = tpu.matmul %0, %1, %cst {dimension_numbers = #tpu.dot_dimension_numbers<[1], [0], [0], [1], [0, 0, 1, 1], [], []>, precision = #tpu.contract_precision<fp32>} : vector<3x5xf32>, vector<5x5xf32>, vector<3x5xf32> -> vector<3x5xf32>
    %6 = vector.broadcast %2 : vector<1x5xf32> to vector<3x5xf32>
    %7 = arith.addf %5, %6 : vector<3x5xf32>
    %8 = math.tanh %7 : vector<3x5xf32>
    %cst_6 = arith.constant dense<0.000000e+00> : vector<3x5xf32>
    %9 = tpu.matmul %8, %3, %cst_6 {dimension_numbers = #tpu.dot_dimension_numbers<[1], [0], [0], [1], [0, 0, 1, 1], [], []>, precision = #tpu.contract_precision<fp32>} : vector<3x5xf32>, vector<5x5xf32>, vector<3x5xf32> -> vector<3x5xf32>
    %10 = vector.broadcast %4 : vector<1x5xf32> to vector<3x5xf32>
    %11 = arith.addf %9, %10 : vector<3x5xf32>
    %12 = math.tanh %11 : vector<3x5xf32>
    %c0_7 = arith.constant 0 : index
    %c0_8 = arith.constant 0 : index
    %13 = vector.load %arg2[%c0_7, %c0_8] : memref<3x5xf32, #tpu.memory_space<vmem>>, vector<3x5xf32>
    tpu.vector_store %arg2[%c0_7, %c0_8], %12 {strides = array<i32>} : memref<3x5xf32, #tpu.memory_space<vmem>>, vector<3x5xf32>,
    return
  }
}

</mosaic_0001>

<bundles_post_ra>
// kernel: mlp3_forward.1
= control target key start
LH: loop header
LB: loop body
LE: loop exit
PB: predicated region body
PF: predicated region fallthrough
CT: control target
= control target key end

     0   :  { %vm25_vm0 = vcmask 1044480   ;;  %v1064_v1 = vmov 0.0   ;;  %vm21_vm1 = vcmask 39936   ;;  %vm1065_vm2 = vmmov 0   ;;  %s1140_s0 = inlined_call_operand.vmem [shape: f32[3,5], index: 0, kind: input, shape index: {}]   ;;  %s1141_s1 = inlined_call_operand.vmem [shape: f32[16,5], index: 1, kind: input, shape index: {}]   ;;  %s1142_s2 = inlined_call_operand.hbm [shape: f32[3,5], index: 2, kind: output, shape index: {}]  }
   0x1   :  { %v13_v0 = vld [vmem:[%s1141_s1] sm:$0x1f]  ;;  %975 = vmatprep.subr.mxu0 %v1064_v1  ;;  %980 = vmatprep.subr.mxu1 %v1064_v1 }
   0x2   :  { %v27_v2 = vsel %vm25_vm0, %v13_v0, 0  ;;  %v12_v3 = vld [vmem:[%s1140_s0] sm:$0x7]  ;;  %977 = vmatprep.mubr.msk.f32.mxu0 %vm1065_vm2, %v1064_v1  ;;  %982 = vmatprep.mubr.msk.f32.mxu1 %vm1065_vm2, %v1064_v1 }
   0x3   :  { %v60_v4 = vand.u32 4294901760, %v27_v2  ;;  %v23_v5 = vsel %vm21_vm1, %v12_v3, 0 }
   0x4   :  { %v95_v6 = vand.u32 4294901760, %v23_v5 }
   0x5   :  { %7 = vsyncpa [#allocation3], 0  ;;  %976 = vmatpush3.msra.mxu0 %v60_v4  ;;  %v137_v7 = vsub.f32 %v27_v2, %v60_v4  ;;  %v15_v15 = vld [vmem:[%s1141_s1 + $0x8] sm:$0x1f]  ;;  %v949_v22 = vld [vmem:[%s1141_s1 + $0x5] ss:$0 sm:$0xff] }
   0x6   :  { %985 = vmatprep.subr.mxu0 %v1064_v1  ;;  %v96_v8 = vsub.f32 %v23_v5, %v95_v6  ;;  %v484_v16 = vsel %vm25_vm0, %v15_v15, 0  ;;  %v950_v52 = vld [vmem:[%s1141_s1 + $0xd] ss:$0 sm:$0xff]  ;;  %s1066_s18 = smov [#allocation2]   ;;  %vm933_vm3 = vcmask 34816  }
   0x7   :  { %v138_v9 = vand.u32 4294901760, %v137_v7  ;;  %v517_v17 = vand.u32 4294901760, %v484_v16  ;;  %s941_s19 = sshll.u32 %s1066_s18, 4  ;;  %s942_s19 = int_to_ptr.vmem [resolvable:$true] %s941_s19 }
   0x8   :  { %v97_v10 = vand.u32 4294901760, %v96_v8  ;;  %s1042_s1 = scalar_lea.vmem %s942_s19, 64  ;;  %p1047_p1 = scmp.lt.s32.totalorder %s942_s19, %s942_s19 }
   0x9   :  { %v139_v11 = vsub.f32 %v137_v7, %v138_v9  ;;  %v594_v18 = vsub.f32 %v484_v16, %v517_v17  ;;  %p1043_p0 = scmp.ne.s32.totalorder %s942_s19, %s1042_s1  ;;  %p1048_p2 = scmp.lt.s32.totalorder %s1042_s1, %s1042_s1 }
   0xa   :  { %v98_v12 = vsub.f32 %v96_v8, %v97_v10 }
   0xb   :  { %v140_v13 = vand.u32 4294901760, %v139_v11  ;;  %v595_v19 = vand.u32 4294901760, %v594_v18  ;;  %p1049_p3 = por %p1048_p2, %p1047_p1 }
   0xc   :  { %v99_v14 = vand.u32 4294901760, %v98_v12 }
   0xd   :  { %981 = vmatpush3.msra.mxu1 %v140_v13  ;;  %v596_v20 = vsub.f32 %v594_v18, %v595_v19  ;;  %p1050_p4 = pnand %p1049_p3, %p1043_p0 }
   0xe   :  { %978 = vmatmul.mubr.f32.vlgmr.msra.gmra.mxu0 %v99_v14  ;;  %983 = vmatmul.mubr.f32.vlgmr.msra.gmra.mxu1 %v95_v6 }
   0xf   :  { %986 = vmatpush3.msra.mxu0 %v137_v7  ;;  %990 = vmatprep.subr.mxu1 %v1064_v1  ;;  %v597_v21 = vand.u32 4294901760, %v596_v20 }
  0x10   :  { %991 = vmatpush3.msra.mxu1 %v60_v4  ;;  %987 = vmatprep.mubr.msk.f32.mxu0 %vm1065_vm2, %v1064_v1 }
  0x11   :  { %995 = vmatprep.subr.mxu0 %v1064_v1  ;;  %992 = vmatprep.mubr.msk.f32.mxu1 %vm1065_vm2, %v1064_v1 }
  0x12   :  { %988 = vmatmul.mubr.f32.vlgmr.msra.gmra.mxu0 %v96_v8  ;;  %993 = vmatmul.mubr.f32.vlgmr.msra.gmra.mxu1 %v97_v10 }
  0x13   :  { %996 = vmatpush3.msra.mxu0 %v138_v9  ;;  %1000 = vmatprep.subr.mxu1 %v1064_v1 }
  0x14   :  { %1001 = vmatpush3.msra.mxu1 %v60_v4  ;;  %997 = vmatprep.mubr.msk.f32.mxu0 %vm1065_vm2, %v1064_v1 }
  0x15   :  { %1002 = vmatprep.mubr.msk.f32.mxu1 %vm1065_vm2, %v1064_v1  ;;  %1010 = vmatprep.subr.mxu1 %v1064_v1 }
  0x16   :  { %998 = vmatmul.mubr.f32.vlgmr.msra.gmra.mxu0 %v95_v6  ;;  %1003 = vmatmul.mubr.f32.vlgmr.msra.gmra.mxu1 %v95_v6 }
  0x17   :  { %1012 = vmatprep.mubr.msk.f32.mxu1 %vm1065_vm2, %v1064_v1  ;;  %1005 = vmatprep.subr.mxu0 %v1064_v1 }
  0x18   :  { %1006 = vmatpush3.msra.mxu0 %v517_v17  ;;  %1007 = vmatprep.mubr.msk.f32.mxu0 %vm1065_vm2, %v1064_v1 }
  0x19   :  { %1015 = vmatprep.subr.mxu0 %v1064_v1  ;;  %1011 = vmatpush3.msra.mxu1 %v597_v21 }
  0x1a   :  { %1020 = vmatprep.subr.mxu1 %v1064_v1 }
  0xce   :  { %v101_v23 = vpop.f32.mrf.mxu0  ;;  %v177_v24 = vpop.f32.mrf.mxu1 }
  0xcf   :  { %v102_v25 = vadd.f32 %v949_v22, %v101_v23 }
  0xd0   :  { %v979_v26 = vpop.f32.mrf.mxu0  ;;  %v984_v27 = vpop.f32.mrf.mxu1 }
  0xd1   :  { %v178_v28 = vadd.f32 %v177_v24, %v102_v25 }
  0xd2   :  { %v251_v29 = vpop.f32.mrf.mxu0  ;;  %v325_v30 = vpop.f32.mrf.mxu1 }
  0xd3   :  { %v252_v31 = vadd.f32 %v251_v29, %v178_v28 }
  0xd4   :  { %v989_v32 = vpop.f32.mrf.mxu0  ;;  %v994_v33 = vpop.f32.mrf.mxu1 }
  0xd5   :  { %v326_v34 = vadd.f32 %v325_v30, %v252_v31 }
  0xd6   :  { %v399_v35 = vpop.f32.mrf.mxu0  ;;  %v471_v36 = vpop.f32.mrf.mxu1 }
  0xd7   :  { %v400_v37 = vadd.f32 %v399_v35, %v326_v34 }
  0xd8   :  { %v999_v38 = vpop.f32.mrf.mxu0  ;;  %v1004_v39 = vpop.f32.mrf.mxu1 }
  0xd9   :  { %v472_v40 = vadd.f32 %v471_v36, %v400_v37 }
  0xdb   :  { %1038 = vtanh.f32 %v472_v40 }
  0xe8   :  { %v1039_v41 = vpop.eup %1038 }
  0xe9   :  { %v481_v42 = vsel %vm21_vm1, %v1039_v41, 0 }
  0xea   :  { %v552_v43 = vand.u32 4294901760, %v481_v42 }
  0xec   :  { %v553_v44 = vsub.f32 %v481_v42, %v552_v43  ;;  %1013 = vmatmul.mubr.f32.vlgmr.msra.gmra.mxu1 %v552_v43 }
  0xed   :  { %1021 = vmatpush3.msra.mxu1 %v517_v17  ;;  %1022 = vmatprep.mubr.msk.f32.mxu1 %vm1065_vm2, %v1064_v1 }
  0xee   :  { %v554_v45 = vand.u32 4294901760, %v553_v44  ;;  %1030 = vmatprep.subr.mxu1 %v1064_v1 }
  0xf0   :  { %1023 = vmatmul.mubr.f32.vlgmr.msra.gmra.mxu1 %v554_v45  ;;  %v555_v46 = vsub.f32 %v553_v44, %v554_v45 }
  0xf1   :  { %1031 = vmatpush3.msra.mxu1 %v517_v17  ;;  %1032 = vmatprep.mubr.msk.f32.mxu1 %vm1065_vm2, %v1064_v1 }
  0xf2   :  { %v556_v47 = vand.u32 4294901760, %v555_v46 }
  0xf4   :  { %1008 = vmatmul.mubr.f32.vlgmr.msra.gmra.mxu0 %v556_v47  ;;  %1033 = vmatmul.mubr.f32.vlgmr.msra.gmra.mxu1 %v552_v43 }
  0xf5   :  { %1016 = vmatpush3.msra.mxu0 %v594_v18  ;;  %1017 = vmatprep.mubr.msk.f32.mxu0 %vm1065_vm2, %v1064_v1 }
  0xf6   :  { %1025 = vmatprep.subr.mxu0 %v1064_v1 }
  0xf8   :  { %1018 = vmatmul.mubr.f32.vlgmr.msra.gmra.mxu0 %v553_v44 }
  0xf9   :  { %1026 = vmatpush3.msra.mxu0 %v595_v19  ;;  %1027 = vmatprep.mubr.msk.f32.mxu0 %vm1065_vm2, %v1064_v1 }
  0xfc   :  { %1028 = vmatmul.mubr.f32.vlgmr.msra.gmra.mxu0 %v552_v43 }
 0x1ac   :  { %v634_v48 = vpop.f32.mrf.mxu1 }
 0x1ae   :  { %v1014_v49 = vpop.f32.mrf.mxu1 }
 0x1b0   :  { %v782_v50 = vpop.f32.mrf.mxu1 }
 0x1b2   :  { %v1024_v51 = vpop.f32.mrf.mxu1 }
 0x1b4   :  { %v558_v53 = vpop.f32.mrf.mxu0  ;;  %v928_v54 = vpop.f32.mrf.mxu1 }
 0x1b5   :  { %v559_v55 = vadd.f32 %v950_v52, %v558_v53 }
 0x1b6   :  { %v1009_v56 = vpop.f32.mrf.mxu0  ;;  %v1034_v57 = vpop.f32.mrf.mxu1 }
 0x1b7   :  { %v635_v58 = vadd.f32 %v634_v48, %v559_v55 }
 0x1b8   :  { %v708_v59 = vpop.f32.mrf.mxu0 }
 0x1b9   :  { %v709_v60 = vadd.f32 %v708_v59, %v635_v58 }
 0x1ba   :  { %v1019_v61 = vpop.f32.mrf.mxu0 }
 0x1bb   :  { %v783_v62 = vadd.f32 %v782_v50, %v709_v60 }
 0x1bc   :  { %v856_v63 = vpop.f32.mrf.mxu0 }
 0x1bd   :  { %v857_v0 = vadd.f32 %v856_v63, %v783_v62 }
 0x1be   :  { %v1029_v1 = vpop.f32.mrf.mxu0 }
 0x1bf   :  { %v929_v2 = vadd.f32 %v928_v54, %v857_v0 }
 0x1c1   :  { %1040 = vtanh.f32 %v929_v2 }
 0x1ce   :  { %v1041_v3 = vpop.eup %1040 }
 0x1cf   :  { %934 = vst.msk [vmem:[#allocation2] sm:$0x7] %vm933_vm3, %v1041_v3 }
 0x1d0   :  { %1053 = shalt.err (!%p1050_p4)
}
 0x1d1   :  { %944 = dma.vmem_to_hbm [thread:$0]  %s942_s19, 64, %s1142_s2, [#allocation3]  }
 0x1d2   :  { %1062 = dma.done.wait [#allocation3], 64  }
 0x1d3   :  { %1063 = vsyncadd [#allocation3], 4294967232 }
 0x1d4   :  { %948 = vsyncpa [#allocation3], 1 }

</bundles_post_ra>
